<compile_context>
chip_gen: v5e
topology: v5e:2x2
jax: 0.10.0
libtpu: 0.0.40
codegen_flags: <defaults>
</compile_context>

<pallas_src>
import functools

import jax
import jax.numpy as jnp
from jax.experimental import pallas as pl
from jax.experimental.pallas import tpu as pltpu


# ----------------------------------------------------------------------------
# Fused Pallas kernel: num_layers LSTM cell steps + padded FC/sigmoid head
# ----------------------------------------------------------------------------
def fused_lstm_fc_kernel(x_ref, w_ref, b_ref, fcw_ref, fcb_ref, out_ref, *,
                         num_layers, hidden_size):
    """Shapes (all f32, all resident in VMEM):

      x_ref   : (B, d_max)            input, zero-padded to d_max lanes
      w_ref   : (L, d_max, 3H)        packed [i|g|o] gate weights per layer
                                      (g columns pre-scaled by 2,
                                       layer-0 rows >= input_size are zero)
      b_ref   : (L, 1, 3H)            packed gate biases (g pre-scaled by 2)
      fcw_ref : (H, O_pad)            concatenated+padded FC-head weights
      fcb_ref : (1, O_pad)            concatenated+padded FC-head biases
      out_ref : (B, O_pad)            lane-dense sigmoid(FC) output
    """
    H = hidden_size
    d_max = w_ref.shape[1]

    h = x_ref[...]                                        # (B, d_max)
    for layer in range(num_layers):
        if h.shape[1] < d_max:
            # Only needed when input_size > hidden_size; the matching weight
            # rows are zero, so the padding values never contribute.
            h = jnp.concatenate(
                [h, jnp.zeros((h.shape[0], d_max - h.shape[1]), h.dtype)],
                axis=1)

        # One fused MXU pass per layer: packed [i | g | o] gates -> (B, 3H).
        z = (jnp.dot(h, w_ref[layer], preferred_element_type=jnp.float32)
             + b_ref[layer])

        # One full-width sigmoid over the packed gate vreg (single EUP pass).
        # g columns were pre-scaled by 2, so tanh(g_pre) = 2*sigmoid(2*g_pre)-1.
        s = jax.nn.sigmoid(z)
        i_g = s[:, 0 * H:1 * H]
        g_g = 2.0 * s[:, 1 * H:2 * H] - 1.0
        o_g = s[:, 2 * H:3 * H]

        # seq_len == 1, zero initial (h0, c0):
        #   c_new = i*g   (forget term f*c_prev is exactly zero)
        #   h_new = o * tanh(c_new)
        h = o_g * jnp.tanh(i_g * g_g)                     # (B, H)

    zf = (jnp.dot(h, fcw_ref[...], preferred_element_type=jnp.float32)
          + fcb_ref[...])
    out_ref[...] = jax.nn.sigmoid(zf)                     # lane-dense store


# ----------------------------------------------------------------------------
# Jitted forward: one pallas_call + head-splitting glue
# ----------------------------------------------------------------------------
@functools.partial(jax.jit, static_argnames=("num_layers", "output_size"))
def lstm_network_forward(x, w_slab, b_slab, fc_w_pad, fc_b_pad, *,
                         num_layers, output_size):
    B = x.shape[0]
    d_max = w_slab.shape[1]
    H = fc_w_pad.shape[0]
    o_pad = fc_w_pad.shape[1]

    if x.shape[1] < d_max:
        x = jnp.pad(x, ((0, 0), (0, d_max - x.shape[1])))

    out_pad = pl.pallas_call(
        functools.partial(fused_lstm_fc_kernel,
                          num_layers=num_layers, hidden_size=H),
        out_shape=jax.ShapeDtypeStruct((B, o_pad), jnp.float32),
        in_specs=[pl.BlockSpec(memory_space=pltpu.MemorySpace.VMEM)] * 5,
        out_specs=pl.BlockSpec(memory_space=pltpu.MemorySpace.VMEM),
    )(x, w_slab, b_slab, fc_w_pad, fc_b_pad)

    # Split the padded slab back into the 5 heads (fused into the jit).
    # Padded lanes [o_total:o_pad) hold sigmoid(0)=0.5 garbage and are dropped.
    outs, off = [], 0
    for o in output_size:
        outs.append(out_pad[:, off:off + o])
        off += o
    return tuple(outs)


# ----------------------------------------------------------------------------
# Model container (PyTorch-like init) + kernel-layout parameter prep
# ----------------------------------------------------------------------------
class LSTMNetworkPallas:
    def __init__(self, input_size, hidden_size, num_layers, output_size, key):
        self.input_size = input_size
        self.hidden_size = hidden_size
        self.num_layers = num_layers
        self.output_size = tuple(output_size)

        H = hidden_size
        k = float(H) ** -0.5
        d_max = max(input_size, hidden_size)

        # --- LSTM parameters, PyTorch layout (for the reference check) ------
        self.torch_lstm_params = []
        # --- kernel layout: one packed weight slab + one packed bias slab ---
        w_layers, b_layers = [], []
        for layer in range(num_layers):
            d_in = input_size if layer == 0 else hidden_size
            key, k1, k2, k3, k4 = jax.random.split(key, 5)
            w_ih = jax.random.uniform(k1, (4 * H, d_in), jnp.float32, -k, k)
            w_hh = jax.random.uniform(k2, (4 * H, H), jnp.float32, -k, k)
            b_ih = jax.random.uniform(k3, (4 * H,), jnp.float32, -k, k)
            b_hh = jax.random.uniform(k4, (4 * H,), jnp.float32, -k, k)
            self.torch_lstm_params.append((w_ih, w_hh, b_ih, b_hh))

            b = b_ih + b_hh
            # PyTorch gate order [i, f, g, o]; f multiplies c0 == 0 -> dropped.
            # g-gate weight/bias pre-scaled by 2 so one sigmoid covers all
            # gates and tanh is recovered as 2*sigmoid(2x)-1 in the kernel.
            w_i = w_ih[0 * H:1 * H].T                      # (d_in, H)
            w_g = w_ih[2 * H:3 * H].T * 2.0
            w_o = w_ih[3 * H:4 * H].T
            b_i = b[0 * H:1 * H]
            b_g = b[2 * H:3 * H] * 2.0
            b_o = b[3 * H:4 * H]
            w_igo = jnp.concatenate([w_i, w_g, w_o], axis=1)        # (d_in, 3H)
            b_igo = jnp.concatenate([b_i, b_g, b_o]).reshape(1, 3 * H)
            if d_in < d_max:
                w_igo = jnp.pad(w_igo, ((0, d_max - d_in), (0, 0)))
            w_layers.append(w_igo)
            b_layers.append(b_igo)
        self.w_slab = jnp.stack(w_layers, axis=0)          # (L, d_max, 3H)
        self.b_slab = jnp.stack(b_layers, axis=0)          # (L, 1, 3H)

        # --- FC heads: PyTorch layout + fused/padded kernel layout ----------
        self.torch_fc_params = []
        ws, bs = [], []
        for o in self.output_size:
            key, k1, k2 = jax.random.split(key, 3)
            w = jax.random.uniform(k1, (o, H), jnp.float32, -k, k)
            b = jax.random.uniform(k2, (o,), jnp.float32, -k, k)
            self.torch_fc_params.append((w, b))
            ws.append(w.T)                                  # (H, o)
            bs.append(b)
        o_total = sum(self.output_size)
        o_pad = max(128, ((o_total + 127) // 128) * 128)    # lane-dense output
        w_cat = jnp.concatenate(ws, axis=1)                 # (H, o_total)
        b_cat = jnp.concatenate(bs, axis=0).reshape(1, -1)  # (1, o_total)
        self.fc_w_pad = jnp.pad(w_cat, ((0, 0), (0, o_pad - o_total)))
        self.fc_b_pad = jnp.pad(b_cat, ((0, 0), (0, o_pad - o_total)))

    def __call__(self, x):
        return lstm_network_forward(
            x, self.w_slab, self.b_slab, self.fc_w_pad, self.fc_b_pad,
            num_layers=self.num_layers, output_size=self.output_size)


# ----------------------------------------------------------------------------
# Pure-JAX reference using the untransformed PyTorch-layout parameters
# (full LSTM math incl. h@W_hh and forget gate, with zero initial state).
# ----------------------------------------------------------------------------
def reference_forward(model, x):
    B = x.shape[0]
    H = model.hidden_size
    h_in = x
    for (w_ih, w_hh, b_ih, b_hh) in model.torch_lstm_params:
        h = jnp.zeros((B, H), jnp.float32)
        c = jnp.zeros((B, H), jnp.float32)
        gates = h_in @ w_ih.T + h @ w_hh.T + b_ih + b_hh
        i = jax.nn.sigmoid(gates[:, 0 * H:1 * H])
        f = jax.nn.sigmoid(gates[:, 1 * H:2 * H])
        g = jnp.tanh(gates[:, 2 * H:3 * H])
        o = jax.nn.sigmoid(gates[:, 3 * H:4 * H])
        c = f * c + i * g
        h_in = o * jnp.tanh(c)
    return tuple(jax.nn.sigmoid(h_in @ w.T + b)
                 for (w, b) in model.torch_fc_params)


# ----------------------------------------------------------------------------
if __name__ == "__main__":
    key = jax.random.PRNGKey(0)
    key, pkey, xkey = jax.random.split(key, 3)

    batch = 2
    input_size = 16
    hidden_size = 32
    num_layers = 2
    output_size = (4, 3, 5, 2, 6)

    model = LSTMNetworkPallas(input_size, hidden_size, num_layers,
                              output_size, pkey)

    x = jax.random.normal(xkey, (batch, input_size), jnp.float32)

    outs = model(x)
    outs = jax.block_until_ready(outs)

    refs = reference_forward(model, x)
    for o, r in zip(outs, refs):
        assert o.shape == r.shape
        assert float(jnp.max(jnp.abs(o - r))) < 2e-5, "mismatch vs reference"

    print("KERNEL_OK")
</pallas_src>

<mosaic_0001>
module attributes {stable_mosaic.version = 11 : i64} {
  func.func @fused_lstm_fc_kernel(%arg0: memref<2x32xf32, #tpu.memory_space<vmem>>, %arg1: memref<2x32x96xf32, #tpu.memory_space<vmem>>, %arg2: memref<2x1x96xf32, #tpu.memory_space<vmem>>, %arg3: memref<32x128xf32, #tpu.memory_space<vmem>>, %arg4: memref<1x128xf32, #tpu.memory_space<vmem>>, %arg5: memref<2x128xf32, #tpu.memory_space<vmem>>) attributes {dimension_semantics = [], scalar_prefetch = 0 : i64, scratch_operands = 0 : i64, tpu.core_type = #tpu.core_type<tc>} {
    %c0 = arith.constant 0 : index
    %c0_0 = arith.constant 0 : index
    %0 = vector.load %arg0[%c0, %c0_0] : memref<2x32xf32, #tpu.memory_space<vmem>>, vector<2x32xf32>
    %c0_1 = arith.constant 0 : index
    %c0_2 = arith.constant 0 : index
    %c0_3 = arith.constant 0 : index
    %1 = vector.load %arg1[%c0_1, %c0_2, %c0_3] : memref<2x32x96xf32, #tpu.memory_space<vmem>>, vector<1x32x96xf32>
    %2 = vector.shape_cast %1 : vector<1x32x96xf32> to vector<32x96xf32>
    %cst = arith.constant dense<0.000000e+00> : vector<2x96xf32>
    %3 = tpu.matmul %0, %2, %cst {dimension_numbers = #tpu.dot_dimension_numbers<[1], [0], [0], [1], [0, 0, 1, 1], [], []>} : vector<2x32xf32>, vector<32x96xf32>, vector<2x96xf32> -> vector<2x96xf32>
    %c0_4 = arith.constant 0 : index
    %c0_5 = arith.constant 0 : index
    %c0_6 = arith.constant 0 : index
    %4 = vector.load %arg2[%c0_4, %c0_5, %c0_6] : memref<2x1x96xf32, #tpu.memory_space<vmem>>, vector<1x1x96xf32>
    %5 = vector.shape_cast %4 : vector<1x1x96xf32> to vector<1x96xf32>
    %6 = vector.broadcast %5 : vector<1x96xf32> to vector<2x96xf32>
    %7 = arith.addf %3, %6 : vector<2x96xf32>
    %8 = arith.negf %7 : vector<2x96xf32>
    %9 = math.exp %8 : vector<2x96xf32>
    %cst_7 = arith.constant 1.000000e+00 : f32
    %10 = vector.broadcast %cst_7 : f32 to vector<2x96xf32>
    %11 = arith.addf %10, %9 : vector<2x96xf32>
    %12 = arith.divf %10, %11 : vector<2x96xf32>
    %13 = vector.extract_strided_slice %12 {offsets = [0, 0], sizes = [2, 32], strides = [1, 1]} : vector<2x96xf32> to vector<2x32xf32>
    %14 = vector.extract_strided_slice %12 {offsets = [0, 32], sizes = [2, 32], strides = [1, 1]} : vector<2x96xf32> to vector<2x32xf32>
    %cst_8 = arith.constant 2.000000e+00 : f32
    %15 = vector.broadcast %cst_8 : f32 to vector<2x32xf32>
    %16 = arith.mulf %15, %14 : vector<2x32xf32>
    %cst_9 = arith.constant 1.000000e+00 : f32
    %17 = vector.broadcast %cst_9 : f32 to vector<2x32xf32>
    %18 = arith.subf %16, %17 : vector<2x32xf32>
    %19 = vector.extract_strided_slice %12 {offsets = [0, 64], sizes = [2, 32], strides = [1, 1]} : vector<2x96xf32> to vector<2x32xf32>
    %20 = arith.mulf %13, %18 : vector<2x32xf32>
    %21 = math.tanh %20 : vector<2x32xf32>
    %22 = arith.mulf %19, %21 : vector<2x32xf32>
    %c1 = arith.constant 1 : index
    %c0_10 = arith.constant 0 : index
    %c0_11 = arith.constant 0 : index
    %23 = vector.load %arg1[%c1, %c0_10, %c0_11] : memref<2x32x96xf32, #tpu.memory_space<vmem>>, vector<1x32x96xf32>
    %24 = vector.shape_cast %23 : vector<1x32x96xf32> to vector<32x96xf32>
    %cst_12 = arith.constant dense<0.000000e+00> : vector<2x96xf32>
    %25 = tpu.matmul %22, %24, %cst_12 {dimension_numbers = #tpu.dot_dimension_numbers<[1], [0], [0], [1], [0, 0, 1, 1], [], []>} : vector<2x32xf32>, vector<32x96xf32>, vector<2x96xf32> -> vector<2x96xf32>
    %c1_13 = arith.constant 1 : index
    %c0_14 = arith.constant 0 : index
    %c0_15 = arith.constant 0 : index
    %26 = vector.load %arg2[%c1_13, %c0_14, %c0_15] : memref<2x1x96xf32, #tpu.memory_space<vmem>>, vector<1x1x96xf32>
    %27 = vector.shape_cast %26 : vector<1x1x96xf32> to vector<1x96xf32>
    %28 = vector.broadcast %27 : vector<1x96xf32> to vector<2x96xf32>
    %29 = arith.addf %25, %28 : vector<2x96xf32>
    %30 = arith.negf %29 : vector<2x96xf32>
    %31 = math.exp %30 : vector<2x96xf32>
    %cst_16 = arith.constant 1.000000e+00 : f32
    %32 = vector.broadcast %cst_16 : f32 to vector<2x96xf32>
    %33 = arith.addf %32, %31 : vector<2x96xf32>
    %34 = arith.divf %32, %33 : vector<2x96xf32>
    %35 = vector.extract_strided_slice %34 {offsets = [0, 0], sizes = [2, 32], strides = [1, 1]} : vector<2x96xf32> to vector<2x32xf32>
    %36 = vector.extract_strided_slice %34 {offsets = [0, 32], sizes = [2, 32], strides = [1, 1]} : vector<2x96xf32> to vector<2x32xf32>
    %cst_17 = arith.constant 2.000000e+00 : f32
    %37 = vector.broadcast %cst_17 : f32 to vector<2x32xf32>
    %38 = arith.mulf %37, %36 : vector<2x32xf32>
    %cst_18 = arith.constant 1.000000e+00 : f32
    %39 = vector.broadcast %cst_18 : f32 to vector<2x32xf32>
    %40 = arith.subf %38, %39 : vector<2x32xf32>
    %41 = vector.extract_strided_slice %34 {offsets = [0, 64], sizes = [2, 32], strides = [1, 1]} : vector<2x96xf32> to vector<2x32xf32>
    %42 = arith.mulf %35, %40 : vector<2x32xf32>
    %43 = math.tanh %42 : vector<2x32xf32>
    %44 = arith.mulf %41, %43 : vector<2x32xf32>
    %c0_19 = arith.constant 0 : index
    %c0_20 = arith.constant 0 : index
    %45 = vector.load %arg3[%c0_19, %c0_20] : memref<32x128xf32, #tpu.memory_space<vmem>>, vector<32x128xf32>
    %cst_21 = arith.constant dense<0.000000e+00> : vector<2x128xf32>
    %46 = tpu.matmul %44, %45, %cst_21 {dimension_numbers = #tpu.dot_dimension_numbers<[1], [0], [0], [1], [0, 0, 1, 1], [], []>} : vector<2x32xf32>, vector<32x128xf32>, vector<2x128xf32> -> vector<2x128xf32>
    %c0_22 = arith.constant 0 : index
    %c0_23 = arith.constant 0 : index
    %47 = vector.load %arg4[%c0_22, %c0_23] : memref<1x128xf32, #tpu.memory_space<vmem>>, vector<1x128xf32>
    %48 = vector.broadcast %47 : vector<1x128xf32> to vector<2x128xf32>
    %49 = arith.addf %46, %48 : vector<2x128xf32>
    %50 = arith.negf %49 : vector<2x128xf32>
    %51 = math.exp %50 : vector<2x128xf32>
    %cst_24 = arith.constant 1.000000e+00 : f32
    %52 = vector.broadcast %cst_24 : f32 to vector<2x128xf32>
    %53 = arith.addf %52, %51 : vector<2x128xf32>
    %54 = arith.divf %52, %53 : vector<2x128xf32>
    %c0_25 = arith.constant 0 : index
    %c0_26 = arith.constant 0 : index
    %55 = vector.load %arg5[%c0_25, %c0_26] : memref<2x128xf32, #tpu.memory_space<vmem>>, vector<2x128xf32>
    tpu.vector_store %arg5[%c0_25, %c0_26], %54 {strides = array<i32>} : memref<2x128xf32, #tpu.memory_space<vmem>>, vector<2x128xf32>,
    return
  }
}

</mosaic_0001>

<bundles_post_ra>
// kernel: lstm_network_forward.1
= control target key start
LH: loop header
LB: loop body
LE: loop exit
PB: predicated region body
PF: predicated region fallthrough
CT: control target
= control target key end

     0   :  { %10 = vsyncpa [#allocation3], 0  ;;  %s395_s0 = inlined_call_operand.vmem [shape: f32[2,32], index: 0, kind: input, shape index: {}]   ;;  %s396_s1 = inlined_call_operand.hbm [shape: f32[2,32,96], index: 1, kind: input, shape index: {}]   ;;  %s397_s2 = inlined_call_operand.vmem [shape: f32[2,1,96], index: 2, kind: input, shape index: {}]   ;;  %s398_s3 = inlined_call_operand.hbm [shape: f32[32,128], index: 3, kind: input, shape index: {}]   ;;  %s399_s4 = inlined_call_operand.vmem [shape: f32[1,128], index: 4, kind: input, shape index: {}]   ;;  %s400_s5 = inlined_call_operand.vmem [shape: f32[2,128], index: 5, kind: output, shape index: {}]  }
   0x1   :  { %s18_s20 = sshll.u32 %s396_s1, 4  ;;  %s19_s20 = int_to_ptr.hbm [resolvable:$true] %s18_s20 }
   0x2   :  { %11 = vsyncpa [#allocation5], 0  ;;  %s329_s21 = smov [#allocation2]   ;;  %s33_s25 = sshll.u32 %s398_s3, 4  ;;  %s34_s25 = int_to_ptr.hbm [resolvable:$true] %s33_s25 }
   0x3   :  { %s20_s22 = sshll.u32 %s329_s21, 4  ;;  %s330_s26 = smov 128   ;;  %s21_s22 = int_to_ptr.vmem [resolvable:$true] %s20_s22 }
   0x4   :  { %s331_s27 = smov 8   ;;  %s332_s28 = smov [#allocation4]  }
   0x5   :  { %26 = dma.hbm_to_vmem [thread:$0]  %s19_s20, 1024, %s21_s22, [#allocation3], %s330_s26, %s330_s26, %s331_s27  }
   0x6   :  { %s35_s29 = sshll.u32 %s332_s28, 4  ;;  %s36_s29 = int_to_ptr.vmem [resolvable:$true] %s35_s29 }
   0x7   :  { %41 = dma.hbm_to_vmem [thread:$0]  %s34_s25, 512, %s36_s29, [#allocation5], %s330_s26, %s330_s26, %s331_s27  }
   0x8   :  { %325 = dma.done.wait [#allocation3], 1024  }
   0x9   :  { %326 = vsyncadd [#allocation3], 4294966272 }
   0xa   :  { %327 = dma.done.wait [#allocation5], 512  }
   0xb   :  { %328 = vsyncadd [#allocation5], 4294966784  ;;  %v56_v0 = vld [vmem:[#allocation2 + $0x18] sm:$0xff]  ;;  %v55_v1 = vld [vmem:[#allocation2 + $0x10] sm:$0xff]  ;;  %vm61_vm0 = vcmask 261120   ;;  %s334_s7 = smov 64  }
   0xc   :  { %77 = vmatpush.msra.mxu0 %v56_v0  ;;  %v54_v2 = vld [vmem:[#allocation2 + $0x8] sm:$0xff]  ;;  %v53_v3 = vld [vmem:[#allocation2] sm:$0xff]  ;;  %v121_v26 = vld [vmem:[#allocation2 + $0x38] sm:$0xff] }
   0xd   :  { %v52_v4 = vld [vmem:[%s395_s0] sm:$0x3]  ;;  %s333_s0 = smov 96   ;;  %v120_v27 = vld [vmem:[#allocation2 + $0x30] sm:$0xff]  ;;  %144 = vmatpush.msra.mxu1 %v121_v26  ;;  %v119_v28 = vld [vmem:[#allocation2 + $0x28] sm:$0xff] }
   0xe   :  { %78 = vmatpush.msra.mxu0 %v55_v1  ;;  %v258_v5 = vld [vmem:[%s397_s2] ss:$0 sm:$0xff]  ;;  %v259_v33 = vld [vmem:[%s397_s2 + $0x1] ss:$0 sm:$0xff]  ;;  %v187_v54 = vld [vmem:[#allocation4 + $0x18] sm:$0xff] }
   0xf   :  { %145 = vmatpush.msra.mxu1 %v120_v27  ;;  %v118_v29 = vld [vmem:[#allocation2 + $0x20] sm:$0xff]  ;;  %v186_v55 = vld [vmem:[#allocation4 + $0x10] sm:$0xff]  ;;  %209 = vmatpush.msra.mxu2 %v187_v54  ;;  %v185_v56 = vld [vmem:[#allocation4 + $0x8] sm:$0xff] }
  0x10   :  { %79 = vmatpush.msra.mxu0 %v54_v2  ;;  %v184_v57 = vld [vmem:[#allocation4] sm:$0xff] }
  0x11   :  { %146 = vmatpush.msra.mxu1 %v119_v28  ;;  %210 = vmatpush.msra.mxu2 %v186_v55  ;;  %v260_v61 = vld [vmem:[%s399_s4] ss:$0 sm:$0xff] }
  0x12   :  { %80 = vmatpush.msra.mxu0 %v53_v3 }
  0x13   :  { %243 = vmatmul.msk.f32.vlgmr.msra.gmra.mxu0 %vm61_vm0, %v52_v4  ;;  %147 = vmatpush.msra.mxu1 %v118_v29 }
  0x14   :  { %211 = vmatpush.msra.mxu2 %v185_v56 }
  0x16   :  { %212 = vmatpush.msra.mxu2 %v184_v57 }
  0x90   :  { %v82_v6 = vpop.f32.mrf.mxu0 }
  0x91   :  { %v83_v7 = vadd.f32 %v258_v5, %v82_v6 }
  0x93   :  { %v244_v8 = vmul.f32 -1.442695, %v83_v7 }
  0x95   :  { %261 = vpow2.f32 %v244_v8 }
  0x9b   :  { %v262_v9 = vpop.eup %261 }
  0x9c   :  { %v88_v10 = vadd.f32 1.0, %v262_v9 }
  0x9e   :  { %263 = vrcp.f32 %v88_v10  ;;  %v100_v14 = vand.u32 2147483648, %v88_v10  ;;  %v98_v16 = vand.u32 2147483647, %v88_v10  ;;  %vm94_vm2 = vweird.f32 %v88_v10 }
  0xa0   :  { %v101_v18 = vor.u32 1.1754944e-38, %v100_v14  ;;  %vm99_vm4 = vcmp.eq.f32.partialorder %v98_v16, 8.507059e+37 }
  0xa4   :  { %v264_v11 = vpop.eup %263 }
  0xa5   :  { %v90_v12 = vmul.f32 %v264_v11, %v88_v10  ;;  %vm95_vm1 = vweird.f32 %v264_v11 }
  0xa6   :  { %vm96_vm3 = vmor %vm94_vm2, %vm95_vm1 }
  0xa7   :  { %v91_v13 = vsub.f32 1.0, %v90_v12 }
  0xa9   :  { %v92_v15 = vmul.f32 %v264_v11, %v91_v13 }
  0xab   :  { %v93_v17 = vadd.f32 %v264_v11, %v92_v15 }
  0xad   :  { %v97_v19 = vsel %vm96_vm3, %v264_v11, %v93_v17 }
  0xae   :  { %v102_v20 = vsel %vm99_vm4, %v101_v18, %v97_v19 }
  0xaf   :  { %v104_v21 = vmul.f32 2.0, %v102_v20 }
  0xb1   :  { %v245_v22 = vadd.f32 -1.0, %v104_v21 }
  0xb3   :  { %107 = vrot.lane.b32.xlu0 %v245_v22, %s333_s0 }
 0x125   :  { %v108_v23 = vpop.permute.xlu0 %107 }
 0x126   :  { %v110_v24 = vmul.f32 %v108_v23, %v102_v20 }
 0x128   :  { %265 = vtanh.f32 %v110_v24 }
 0x12e   :  { %v266_v25 = vpop.eup %265 }
 0x12f   :  { %113 = vrot.lane.b32.xlu0 %v266_v25, %s334_s7 }
 0x1a1   :  { %v114_v30 = vpop.permute.xlu0 %113 }
 0x1a2   :  { %v116_v31 = vmul.f32 %v114_v30, %v102_v20 }
 0x1a4   :  { %128 = vrot.lane.b32.xlu1 %v116_v31, %s334_s7 }
 0x216   :  { %v129_v32 = vpop.permute.xlu1 %128 }
 0x217   :  { %247 = vmatmul.msk.f32.vlgmr.msra.gmra.mxu1 %vm61_vm0, %v129_v32 }
 0x294   :  { %v149_v34 = vpop.f32.mrf.mxu1 }
 0x295   :  { %v150_v35 = vadd.f32 %v259_v33, %v149_v34 }
 0x297   :  { %v248_v36 = vmul.f32 -1.442695, %v150_v35 }
 0x299   :  { %267 = vpow2.f32 %v248_v36 }
 0x29f   :  { %v268_v37 = vpop.eup %267 }
 0x2a0   :  { %v155_v38 = vadd.f32 1.0, %v268_v37 }
 0x2a2   :  { %269 = vrcp.f32 %v155_v38  ;;  %v167_v42 = vand.u32 2147483648, %v155_v38  ;;  %v165_v44 = vand.u32 2147483647, %v155_v38  ;;  %vm161_vm6 = vweird.f32 %v155_v38 }
 0x2a4   :  { %v168_v46 = vor.u32 1.1754944e-38, %v167_v42  ;;  %vm166_vm8 = vcmp.eq.f32.partialorder %v165_v44, 8.507059e+37 }
 0x2a8   :  { %v270_v39 = vpop.eup %269 }
 0x2a9   :  { %v157_v40 = vmul.f32 %v270_v39, %v155_v38  ;;  %vm162_vm5 = vweird.f32 %v270_v39 }
 0x2aa   :  { %vm163_vm7 = vmor %vm161_vm6, %vm162_vm5 }
 0x2ab   :  { %v158_v41 = vsub.f32 1.0, %v157_v40 }
 0x2ad   :  { %v159_v43 = vmul.f32 %v270_v39, %v158_v41 }
 0x2af   :  { %v160_v45 = vadd.f32 %v270_v39, %v159_v43 }
 0x2b1   :  { %v164_v47 = vsel %vm163_vm7, %v270_v39, %v160_v45 }
 0x2b2   :  { %v169_v48 = vsel %vm166_vm8, %v168_v46, %v164_v47 }
 0x2b3   :  { %v171_v49 = vmul.f32 2.0, %v169_v48 }
 0x2b5   :  { %v249_v50 = vadd.f32 -1.0, %v171_v49 }
 0x2b7   :  { %174 = vrot.lane.b32.xlu1 %v249_v50, %s333_s0 }
 0x329   :  { %v175_v51 = vpop.permute.xlu1 %174 }
 0x32a   :  { %v177_v52 = vmul.f32 %v175_v51, %v169_v48 }
 0x32c   :  { %271 = vtanh.f32 %v177_v52 }
 0x332   :  { %v272_v53 = vpop.eup %271 }
 0x333   :  { %180 = vrot.lane.b32.xlu2 %v272_v53, %s334_s7 }
 0x38d   :  { %v181_v58 = vpop.permute.xlu2 %180 }
 0x38e   :  { %v183_v59 = vmul.f32 %v181_v58, %v169_v48 }
 0x390   :  { %193 = vrot.lane.b32.xlu2 %v183_v59, %s334_s7 }
 0x3ea   :  { %v194_v60 = vpop.permute.xlu2 %193 }
 0x3eb   :  { %250 = vmatmul.msk.f32.vlgmr.msra.gmra.mxu2 %vm61_vm0, %v194_v60 }
 0x46e   :  { %v214_v62 = vpop.f32.mrf.mxu2 }
 0x46f   :  { %v215_v63 = vadd.f32 %v260_v61, %v214_v62 }
 0x471   :  { %v251_v0 = vmul.f32 -1.442695, %v215_v63 }
 0x473   :  { %273 = vpow2.f32 %v251_v0 }
 0x479   :  { %v274_v1 = vpop.eup %273 }
 0x47a   :  { %v220_v2 = vadd.f32 1.0, %v274_v1 }
 0x47c   :  { %275 = vrcp.f32 %v220_v2  ;;  %v232_v6 = vand.u32 2147483648, %v220_v2  ;;  %v230_v8 = vand.u32 2147483647, %v220_v2  ;;  %vm226_vm10 = vweird.f32 %v220_v2 }
 0x47e   :  { %v233_v10 = vor.u32 1.1754944e-38, %v232_v6  ;;  %vm231_vm12 = vcmp.eq.f32.partialorder %v230_v8, 8.507059e+37 }
 0x482   :  { %v276_v3 = vpop.eup %275 }
 0x483   :  { %v222_v4 = vmul.f32 %v276_v3, %v220_v2  ;;  %vm227_vm9 = vweird.f32 %v276_v3 }
 0x484   :  { %vm228_vm11 = vmor %vm226_vm10, %vm227_vm9 }
 0x485   :  { %v223_v5 = vsub.f32 1.0, %v222_v4 }
 0x487   :  { %v224_v7 = vmul.f32 %v276_v3, %v223_v5 }
 0x489   :  { %v225_v9 = vadd.f32 %v276_v3, %v224_v7 }
 0x48b   :  { %v229_v11 = vsel %vm228_vm11, %v276_v3, %v225_v9 }
 0x48c   :  { %v234_v12 = vsel %vm231_vm12, %v233_v10, %v229_v11 }
 0x48d   :  { %236 = vst [vmem:[%s400_s5] sm:$0x3] %v234_v12 }
 0x48e   :  { %241 = vsyncpa [#allocation3], 1 }
 0x48f   :  { %242 = vsyncpa [#allocation5], 1 }

</bundles_post_ra>
